<compile_context>
chip_gen: v5e
topology: v5e:2x2
jax: 0.10.0
libtpu: 0.0.40
codegen_flags: <defaults>
</compile_context>

<pallas_src>
import jax
import jax.numpy as jnp
from jax.experimental import pallas as pl
from jax.experimental.pallas import tpu as pltpu


_PN_MAX = 512  # max output-column tile width (multiple of 128)


def _round_up(n: int, m: int) -> int:
    return ((n + m - 1) // m) * m


def _choose_pn(p_pad: int) -> int:
    return p_pad if p_pad <= _PN_MAX else _PN_MAX


# -----------------------------------------------------------------------------
# Fused kernel: one MXU matmul (folded scaler+linear+bias+scatter) + FMA merge
# -----------------------------------------------------------------------------
def _linear_global_kernel(x_ref, slab_ref, pqva_ref, o_ref):
    k_pad = x_ref.shape[1]
    w = slab_ref[0:k_pad, :]                      # folded weight+bias+scatter (k_pad, pn)
    keep = slab_ref[k_pad:k_pad + 1, :]           # f32 keep-mask row          (1, pn)
    fill = jnp.dot(x_ref[...], w, preferred_element_type=jnp.float32)  # (1, pn)
    o_ref[...] = pqva_ref[...] * keep + fill      # fill==0 wherever keep==1


# -----------------------------------------------------------------------------
# One-time parameter folding (outside the forward hot path).
# -----------------------------------------------------------------------------
def fold_linear_global_params(weight, bias, in_mean, in_std, out_mean, out_std,
                              pqva_mask, num_graphs):
    """Fold scalers + bias + static mask scatter into one packed weight slab."""
    weight = jnp.asarray(weight, jnp.float32)
    bias = jnp.asarray(bias, jnp.float32)
    out_size, in_size = weight.shape
    B = int(num_graphs)

    # ---- fold input scaler, linear, inverse output scaler into one affine ----
    # TODO(synk): reference semantics divide by in_std with no zero guard.
    w_eff = (weight.T / in_std[:, None]) * out_std[None, :]                # (in, out)
    b_eff = (bias - (in_mean / in_std) @ weight.T) * out_std + out_mean    # (out,)

    # ---- static scatter plan: PQVA_prediction[~mask] = out.flatten() ---------
    mask_flat = jnp.asarray(pqva_mask).reshape(-1)
    p = int(mask_flat.shape[0])
    n_pred = int(jnp.sum(~mask_flat))
    assert n_pred == B * out_size, (
        f"popcount(~PQVA_mask)={n_pred} must equal num_graphs*output_size="
        f"{B * out_size}")

    rank = jnp.cumsum(~mask_flat) - 1                     # rank among unmasked slots
    rank = jnp.where(~mask_flat, rank, 0)
    b_idx = rank // out_size                               # which graph fills slot q
    o_idx = rank % out_size                                # which output column fills q
    unmask = (~mask_flat).astype(jnp.float32)              # (p,)

    # Fold the one-hot scatter through the linear layer (exact: one-hot select):
    #   fill[q] = sum_i x[b_idx[q], i] * w_eff[i, o_idx[q]] + b_eff[o_idx[q]]
    w_cols = w_eff[:, o_idx]                                               # (in, p)
    sel_b = (jnp.arange(B)[:, None] == b_idx[None, :]).astype(jnp.float32)  # (B, p)
    w_comb = (sel_b[:, None, :] * w_cols[None, :, :] * unmask[None, None, :]
              ).reshape(B * in_size, p)                                    # (B*in, p)
    fill_bias = b_eff[o_idx] * unmask                                      # (p,)

    # ---- pack everything into one lane-dense slab ----------------------------
    k_eff = B * in_size
    k_pad = _round_up(k_eff + 1, 128)            # +1 row for the folded bias
    p_pad = _round_up(max(p, 128), 128)
    pn = _choose_pn(p_pad)
    p_pad = _round_up(p_pad, pn)                 # make column tiles divide evenly

    # slab rows [0, k_eff): folded weight*scatter; row k_eff: folded bias;
    # row k_pad: f32 keep-mask (1.0 = keep original PQVA entry).
    slab = jnp.zeros((k_pad + 8, p_pad), jnp.float32)
    slab = slab.at[:k_eff, :p].set(w_comb)
    slab = slab.at[k_eff, :p].set(fill_bias)
    slab = slab.at[k_pad, :p].set(mask_flat.astype(jnp.float32))
    slab = slab.at[k_pad, p:].set(1.0)           # padded columns: keep (zero) pqva

    return {"slab": slab}


# -----------------------------------------------------------------------------
# Forward: one pallas_call + trivial pad / slice layout plumbing.
# -----------------------------------------------------------------------------
@jax.jit
def linear_global_forward(folded, feature_vector, pqva_matrix):
    slab = folded["slab"]
    k_pad = slab.shape[0] - 8
    p_pad = slab.shape[1]
    pn = _choose_pn(p_pad)
    p = pqva_matrix.size

    # x_aug = [flatten(x), 1, 0...] — the 1.0 activates the folded-bias row.
    x_flat = feature_vector.astype(jnp.float32).reshape(1, -1)
    k_eff = x_flat.shape[1]
    x_aug = jnp.zeros((1, k_pad), jnp.float32)
    x_aug = x_aug.at[0, :k_eff].set(x_flat[0])
    x_aug = x_aug.at[0, k_eff].set(1.0)

    pqva_pad = jnp.zeros((1, p_pad), jnp.float32).at[0, :p].set(
        pqva_matrix.astype(jnp.float32).reshape(-1))

    grid = (p_pad // pn,)
    # Per-step VMEM (double-buffered): slab tile + pqva tile + out tile + x.
    block_bytes = 4 * ((k_pad + 8) * pn + k_pad + 2 * pn)
    vmem_limit = int(min(max(4 * block_bytes, 4 << 20), 48 << 20))

    out_pad = pl.pallas_call(
        _linear_global_kernel,
        out_shape=jax.ShapeDtypeStruct((1, p_pad), jnp.float32),
        grid_spec=pltpu.PrefetchScalarGridSpec(
            num_scalar_prefetch=0,
            grid=grid,
            in_specs=[
                pl.BlockSpec((1, k_pad), lambda j: (0, 0)),        # x: VMEM-resident
                pl.BlockSpec((k_pad + 8, pn), lambda j: (0, j)),   # packed constants
                pl.BlockSpec((1, pn), lambda j: (0, j)),           # pqva column window
            ],
            out_specs=pl.BlockSpec((1, pn), lambda j: (0, j)),
        ),
        compiler_params=pltpu.CompilerParams(
            dimension_semantics=("parallel",),     # v7x: 2 TCs split the p tiles
            vmem_limit_bytes=vmem_limit,
        ),
    )(x_aug, slab, pqva_pad)

    return out_pad[0, :p].reshape(pqva_matrix.shape)


# -----------------------------------------------------------------------------
# Pure-JAX reference (unfolded, matches the torch module) for correctness check
# -----------------------------------------------------------------------------
def _reference(feature_vector, weight, bias, in_mean, in_std,
               out_mean, out_std, pqva_matrix, pqva_mask):
    x = (feature_vector - in_mean) / in_std
    y = x @ weight.T + bias
    y = y * out_std + out_mean
    mask_flat = pqva_mask.reshape(-1)
    pqva_flat = pqva_matrix.reshape(-1)
    idx = jnp.clip(jnp.cumsum(~mask_flat) - 1, 0, y.size - 1)
    pred_flat = jnp.where(mask_flat, pqva_flat, y.reshape(-1)[idx])
    return pred_flat.reshape(pqva_matrix.shape)


if __name__ == "__main__":
    key = jax.random.PRNGKey(0)
    k_x, k_w, k_b, k_im, k_is, k_om, k_os, k_pq, k_perm = jax.random.split(key, 9)

    # Small synthetic shapes consistent with the module:
    #   num_graphs (batch) = 2, input_size = 32, output_size = 16
    #   num_nodes_total = 16, 4 PQVA quantities per node -> 64 entries,
    #   of which exactly batch * output_size = 32 are ~mask (to be filled).
    B, IN_SIZE, OUT_SIZE = 2, 32, 16
    N_NODES, N_PQVA = 16, 4

    feature_vector = jax.random.normal(k_x, (B, IN_SIZE), jnp.float32)

    # torch.nn.Linear-style parameters (deterministic synthetic init)
    weight = jax.random.normal(k_w, (OUT_SIZE, IN_SIZE), jnp.float32) * 0.1
    bias = jax.random.normal(k_b, (OUT_SIZE,), jnp.float32) * 0.1

    # StandardScaler parameters (mean / std vectors)
    in_mean = jax.random.normal(k_im, (IN_SIZE,), jnp.float32)
    in_std = jax.random.uniform(k_is, (IN_SIZE,), jnp.float32, 0.5, 1.5)
    out_mean = jax.random.normal(k_om, (OUT_SIZE,), jnp.float32)
    out_std = jax.random.uniform(k_os, (OUT_SIZE,), jnp.float32, 0.5, 1.5)

    pqva_matrix = jax.random.normal(k_pq, (N_NODES, N_PQVA), jnp.float32)
    # Mask with exactly B*OUT_SIZE False entries (positions to be predicted).
    perm = jax.random.permutation(k_perm, N_NODES * N_PQVA)
    mask_flat = jnp.ones((N_NODES * N_PQVA,), jnp.bool_)
    mask_flat = mask_flat.at[perm[: B * OUT_SIZE]].set(False)
    pqva_mask = mask_flat.reshape(N_NODES, N_PQVA)

    # One-time fold (constants: weights, scalers, static mask).
    folded = fold_linear_global_params(weight, bias, in_mean, in_std,
                                       out_mean, out_std, pqva_mask, B)
    folded = jax.tree_util.tree_map(jax.block_until_ready, folded)

    pred = linear_global_forward(folded, feature_vector, pqva_matrix)
    pred = jax.block_until_ready(pred)

    ref = _reference(feature_vector, weight, bias, in_mean, in_std,
                     out_mean, out_std, pqva_matrix, pqva_mask)

    assert pred.shape == pqva_matrix.shape
    assert jnp.allclose(pred, ref, atol=1e-5, rtol=1e-5), "mismatch vs reference"
    print("KERNEL_OK")
</pallas_src>

<mosaic_0001>
module attributes {stable_mosaic.version = 11 : i64} {
  func.func @_linear_global_kernel(%arg0: i32, %arg1: memref<1x128xf32, #tpu.memory_space<vmem>>, %arg2: memref<136x128xf32, #tpu.memory_space<vmem>>, %arg3: memref<1x128xf32, #tpu.memory_space<vmem>>, %arg4: memref<1x128xf32, #tpu.memory_space<vmem>>) attributes {dimension_semantics = [#tpu.dimension_semantics<parallel>], iteration_bounds = array<i64: 1>, scalar_prefetch = 0 : i64, scratch_operands = 0 : i64, tpu.core_type = #tpu.core_type<tc>, window_params = [{pipeline_mode = #tpu.pipeline_mode<synchronous>, transform_indices = @transform_0, window_bounds = array<i64: 1, 128>}, {transform_indices = @transform_1, window_bounds = array<i64: 136, 128>}, {transform_indices = @transform_2, window_bounds = array<i64: 1, 128>}, {transform_indices = @transform_3, window_bounds = array<i64: 1, 128>}]} {
    %c0 = arith.constant 0 : index
    %c0_0 = arith.constant 0 : index
    %0 = vector.load %arg2[%c0, %c0_0] : memref<136x128xf32, #tpu.memory_space<vmem>>, vector<128x128xf32>
    %c128 = arith.constant 128 : index
    %c0_1 = arith.constant 0 : index
    %1 = vector.load %arg2[%c128, %c0_1] : memref<136x128xf32, #tpu.memory_space<vmem>>, vector<1x128xf32>
    %c0_2 = arith.constant 0 : index
    %c0_3 = arith.constant 0 : index
    %2 = vector.load %arg1[%c0_2, %c0_3] : memref<1x128xf32, #tpu.memory_space<vmem>>, vector<1x128xf32>
    %cst = arith.constant dense<0.000000e+00> : vector<1x128xf32>
    %3 = tpu.matmul %2, %0, %cst {dimension_numbers = #tpu.dot_dimension_numbers<[1], [0], [0], [1], [0, 0, 1, 1], [], []>} : vector<1x128xf32>, vector<128x128xf32>, vector<1x128xf32> -> vector<1x128xf32>
    %c0_4 = arith.constant 0 : index
    %c0_5 = arith.constant 0 : index
    %4 = vector.load %arg3[%c0_4, %c0_5] : memref<1x128xf32, #tpu.memory_space<vmem>>, vector<1x128xf32>
    %5 = arith.mulf %4, %1 : vector<1x128xf32>
    %6 = arith.addf %5, %3 : vector<1x128xf32>
    %c0_6 = arith.constant 0 : index
    %c0_7 = arith.constant 0 : index
    %7 = vector.load %arg4[%c0_6, %c0_7] : memref<1x128xf32, #tpu.memory_space<vmem>>, vector<1x128xf32>
    tpu.vector_store %arg4[%c0_6, %c0_7], %6 {strides = array<i32>} : memref<1x128xf32, #tpu.memory_space<vmem>>, vector<1x128xf32>,
    return
  }
  func.func @transform_0(%arg0: i32) -> (i32, i32) {
    %c0_i32 = arith.constant 0 : i32
    %c0_i32_0 = arith.constant 0 : i32
    %c0_i32_1 = arith.constant 0 : i32
    return %c0_i32, %c0_i32_0 : i32, i32
  }
  func.func @transform_1(%arg0: i32) -> (i32, i32) {
    %c0_i32 = arith.constant 0 : i32
    %c0_i32_0 = arith.constant 0 : i32
    return %c0_i32, %arg0 : i32, i32
  }
  func.func @transform_2(%arg0: i32) -> (i32, i32) {
    %c0_i32 = arith.constant 0 : i32
    %c0_i32_0 = arith.constant 0 : i32
    return %c0_i32, %arg0 : i32, i32
  }
  func.func @transform_3(%arg0: i32) -> (i32, i32) {
    %c0_i32 = arith.constant 0 : i32
    %c0_i32_0 = arith.constant 0 : i32
    return %c0_i32, %arg0 : i32, i32
  }
}

</mosaic_0001>

<bundles_post_ra>
// kernel: squeeze.1
= control target key start
LH: loop header
LB: loop body
LE: loop exit
PB: predicated region body
PF: predicated region fallthrough
CT: control target
= control target key end

     0   :  { %s130_s8 = smov 124   ;;  %s131_s9 = smov 108   ;;  %vm7_vm0 = vcmask 31744   ;;  %s221_s0 = inlined_call_operand.vmem [shape: f32[64], index: 0, kind: input, shape index: {}]   ;;  %s222_s1 = inlined_call_operand.vmem [shape: f32[16,4], index: 1, kind: output, shape index: {}]  }
   0x1   :  { %v4_v0 = vld [vmem:[%s221_s0] sm:$0x1]  ;;  %s129_s0 = smov 116   ;;  %s132_s10 = smov 112  }
   0x2   :  { %5 = vst [vmem:[#allocation0] sm:$0x1] %v4_v0  ;;  %s133_s11 = smov 120   ;;  %s134_s12 = smov 104  }
   0x3   :  { %s135_s13 = smov 96   ;;  %s136_s14 = smov 100  }
   0x4   :  { %s137_s15 = smov 92   ;;  %s138_s16 = smov 84  }
   0x5   :  { %s139_s17 = smov 88   ;;  %s140_s18 = smov 80  }
   0x6   :  { %s141_s19 = smov 72   ;;  %s142_s20 = smov 76  }
   0x7   :  { %s143_s21 = smov 68  }
   0x9   :  { %v21_v1 = vld [vmem:[#allocation0] sm:$0x1]  }
   0xa   :  { %v9_v2 = vld [vmem:[#allocation0] sm:$0x1]   ;;  %22 = vrot.lane.b32.xlu1 %v21_v1, %s129_s0 }
   0xb   :  { %10 = vrot.lane.b32.xlu0 %v9_v2, %s130_s8  ;;  %v33_v3 = vld [vmem:[#allocation0] sm:$0x1]  }
   0xc   :  { %34 = vrot.lane.b32.xlu2 %v33_v3, %s131_s9  ;;  %v27_v4 = vld [vmem:[#allocation0] sm:$0x1]  }
   0xd   :  { %v15_v5 = vld [vmem:[#allocation0] sm:$0x1]  }
   0xe   :  { %v39_v6 = vld [vmem:[#allocation0] sm:$0x1]  }
   0xf   :  { %v51_v7 = vld [vmem:[#allocation0] sm:$0x1]  }
  0x10   :  { %v45_v8 = vld [vmem:[#allocation0] sm:$0x1]  }
  0x11   :  { %v57_v9 = vld [vmem:[#allocation0] sm:$0x1]  }
  0x12   :  { %28 = vrot.lane.b32.xlu1 %v27_v4, %s132_s10  ;;  %v69_v10 = vld [vmem:[#allocation0] sm:$0x1]  }
  0x13   :  { %16 = vrot.lane.b32.xlu0 %v15_v5, %s133_s11  ;;  %v63_v11 = vld [vmem:[#allocation0] sm:$0x1]  }
  0x14   :  { %40 = vrot.lane.b32.xlu2 %v39_v6, %s134_s12  ;;  %v75_v12 = vld [vmem:[#allocation0] sm:$0x1]  }
  0x15   :  { %v87_v13 = vld [vmem:[#allocation0] sm:$0x1]  }
  0x16   :  { %v81_v14 = vld [vmem:[#allocation0] sm:$0x1]  }
  0x17   :  { %v93_v15 = vld [vmem:[#allocation0] sm:$0x1]  }
  0x18   :  { %v6_v21 = vld [vmem:[#allocation0] sm:$0x1]  }
  0x19   :  { %8 = vst.msk [vmem:[%s222_s1] sm:$0x1] %vm7_vm0, %v6_v21  }
  0x1a   :  { %52 = vrot.lane.b32.xlu1 %v51_v7, %s135_s13 }
  0x1b   :  { %46 = vrot.lane.b32.xlu0 %v45_v8, %s136_s14 }
  0x1c   :  { %58 = vrot.lane.b32.xlu2 %v57_v9, %s137_s15 }
  0x22   :  { %70 = vrot.lane.b32.xlu1 %v69_v10, %s138_s16 }
  0x23   :  { %64 = vrot.lane.b32.xlu0 %v63_v11, %s139_s17 }
  0x24   :  { %76 = vrot.lane.b32.xlu2 %v75_v12, %s140_s18 }
  0x2a   :  { %88 = vrot.lane.b32.xlu1 %v87_v13, %s141_s19 }
  0x2b   :  { %82 = vrot.lane.b32.xlu0 %v81_v14, %s142_s20 }
  0x2c   :  { %94 = vrot.lane.b32.xlu2 %v93_v15, %s143_s21 }
  0x66   :  { %v35_v16 = vpop.permute.xlu2 %34  }
  0x67   :  { %103 = vst.msk [vmem:[%s222_s1 + $0x5] sm:$0x1] %vm7_vm0, %v35_v16  }
  0x6e   :  { %v41_v17 = vpop.permute.xlu2 %40  }
  0x6f   :  { %104 = vst.msk [vmem:[%s222_s1 + $0x6] sm:$0x1] %vm7_vm0, %v41_v17  }
  0x76   :  { %v59_v18 = vpop.permute.xlu2 %58  }
  0x77   :  { %107 = vst.msk [vmem:[%s222_s1 + $0x9] sm:$0x1] %vm7_vm0, %v59_v18  }
  0x7c   :  { %v23_v19 = vpop.permute.xlu1 %22  }
  0x7d   :  { %v11_v20 = vpop.permute.xlu0 %10   ;;  %101 = vst.msk [vmem:[%s222_s1 + $0x3] sm:$0x1] %vm7_vm0, %v23_v19  }
  0x7e   :  { %99 = vst.msk [vmem:[%s222_s1 + $0x1] sm:$0x1] %vm7_vm0, %v11_v20   ;;  %v77_v22 = vpop.permute.xlu2 %76  }
  0x7f   :  { %110 = vst.msk [vmem:[%s222_s1 + $0xc] sm:$0x1] %vm7_vm0, %v77_v22  }
  0x84   :  { %v29_v23 = vpop.permute.xlu1 %28  }
  0x85   :  { %v17_v24 = vpop.permute.xlu0 %16   ;;  %102 = vst.msk [vmem:[%s222_s1 + $0x4] sm:$0x1] %vm7_vm0, %v29_v23  }
  0x86   :  { %100 = vst.msk [vmem:[%s222_s1 + $0x2] sm:$0x1] %vm7_vm0, %v17_v24   ;;  %v95_v25 = vpop.permute.xlu2 %94  }
  0x87   :  { %113 = vst.msk [vmem:[%s222_s1 + $0xf] sm:$0x1] %vm7_vm0, %v95_v25  }
  0x8c   :  { %v53_v26 = vpop.permute.xlu1 %52  }
  0x8d   :  { %v47_v27 = vpop.permute.xlu0 %46   ;;  %106 = vst.msk [vmem:[%s222_s1 + $0x8] sm:$0x1] %vm7_vm0, %v53_v26  }
  0x8e   :  { %105 = vst.msk [vmem:[%s222_s1 + $0x7] sm:$0x1] %vm7_vm0, %v47_v27  }
  0x94   :  { %v71_v28 = vpop.permute.xlu1 %70  }
  0x95   :  { %v65_v29 = vpop.permute.xlu0 %64   ;;  %109 = vst.msk [vmem:[%s222_s1 + $0xb] sm:$0x1] %vm7_vm0, %v71_v28  }
  0x96   :  { %108 = vst.msk [vmem:[%s222_s1 + $0xa] sm:$0x1] %vm7_vm0, %v65_v29  }
  0x9c   :  { %v89_v30 = vpop.permute.xlu1 %88  }
  0x9d   :  { %v83_v31 = vpop.permute.xlu0 %82   ;;  %112 = vst.msk [vmem:[%s222_s1 + $0xe] sm:$0x1] %vm7_vm0, %v89_v30  }
  0x9e   :  { %111 = vst.msk [vmem:[%s222_s1 + $0xd] sm:$0x1] %vm7_vm0, %v83_v31  }

// kernel: linear_global_forward.1
= control target key start
LH: loop header
LB: loop body
LE: loop exit
PB: predicated region body
PF: predicated region fallthrough
CT: control target
= control target key end

     0   :  { %8 = vsyncpa [#allocation3], 0  ;;  %s106_s15 = smov [#allocation2]   ;;  %s107_s17 = smov 128   ;;  %s141_s0 = inlined_call_operand.vmem [shape: f32[1,128], index: 0, kind: input, shape index: {}]   ;;  %s142_s1 = inlined_call_operand.hbm [shape: f32[136,128], index: 1, kind: input, shape index: {}]   ;;  %s143_s2 = inlined_call_operand.vmem [shape: f32[1,128], index: 2, kind: input, shape index: {}]   ;;  %s144_s3 = inlined_call_operand.vmem [shape: f32[1,128], index: 3, kind: output, shape index: {}]  }
   0x1   :  { %s15_s14 = sshll.u32 %s142_s1, 4  ;;  %s17_s16 = sshll.u32 %s106_s15, 4  ;;  %s16_s14 = int_to_ptr.hbm [resolvable:$true] %s15_s14  ;;  %s18_s16 = int_to_ptr.vmem [resolvable:$true] %s17_s16 }
   0x2   :  { %s108_s18 = smov 8  }
   0x3   :  { %23 = dma.hbm_to_vmem [thread:$0]  %s16_s14, 2176, %s18_s16, [#allocation3], %s107_s17, %s107_s17, %s108_s18  }
   0x4   :  { %104 = dma.done.wait [#allocation3], 2176  }
   0x5   :  { %105 = vsyncadd [#allocation3], 4294965120  ;;  %v45_v0 = vld [vmem:[#allocation2 + $0x78] sm:$0xff]  ;;  %v44_v1 = vld [vmem:[#allocation2 + $0x70] sm:$0xff] }
   0x6   :  { %48 = vmatpush.msra.mxu0 %v45_v0  ;;  %v43_v2 = vld [vmem:[#allocation2 + $0x68] sm:$0xff]  ;;  %v42_v3 = vld [vmem:[#allocation2 + $0x60] sm:$0xff]  ;;  %v41_v4 = vld [vmem:[#allocation2 + $0x58] sm:$0xff] }
   0x7   :  { %v40_v5 = vld [vmem:[#allocation2 + $0x50] sm:$0xff]  ;;  %v39_v6 = vld [vmem:[#allocation2 + $0x48] sm:$0xff]  ;;  %v38_v7 = vld [vmem:[#allocation2 + $0x40] sm:$0xff] }
   0x8   :  { %49 = vmatpush.msra.mxu0 %v44_v1  ;;  %v37_v8 = vld [vmem:[#allocation2 + $0x38] sm:$0xff]  ;;  %v36_v9 = vld [vmem:[#allocation2 + $0x30] sm:$0xff]  ;;  %v35_v10 = vld [vmem:[#allocation2 + $0x28] sm:$0xff] }
   0x9   :  { %v34_v11 = vld [vmem:[#allocation2 + $0x20] sm:$0xff]  ;;  %v33_v12 = vld [vmem:[#allocation2 + $0x18] sm:$0xff]  ;;  %v32_v13 = vld [vmem:[#allocation2 + $0x10] sm:$0xff] }
   0xa   :  { %50 = vmatpush.msra.mxu0 %v43_v2  ;;  %v31_v14 = vld [vmem:[#allocation2 + $0x8] sm:$0xff]  ;;  %v30_v15 = vld [vmem:[#allocation2] sm:$0xff] }
   0xb   :  { %v47_v16 = vld [vmem:[%s141_s0] sm:$0x1] }
   0xc   :  { %51 = vmatpush.msra.mxu0 %v42_v3  ;;  %v46_v17 = vld [vmem:[#allocation2 + $0x80] sm:$0x1] }
   0xd   :  { %v68_v18 = vld [vmem:[%s143_s2] sm:$0x1] }
   0xe   :  { %52 = vmatpush.msra.mxu0 %v41_v4  ;;  %v69_v19 = vmul.f32 %v68_v18, %v46_v17 }
  0x10   :  { %53 = vmatpush.msra.mxu0 %v40_v5 }
  0x12   :  { %54 = vmatpush.msra.mxu0 %v39_v6 }
  0x14   :  { %55 = vmatpush.msra.mxu0 %v38_v7 }
  0x16   :  { %56 = vmatpush.msra.mxu0 %v37_v8 }
  0x18   :  { %57 = vmatpush.msra.mxu0 %v36_v9 }
  0x1a   :  { %58 = vmatpush.msra.mxu0 %v35_v10 }
  0x1c   :  { %59 = vmatpush.msra.mxu0 %v34_v11 }
  0x1e   :  { %60 = vmatpush.msra.mxu0 %v33_v12 }
  0x20   :  { %61 = vmatpush.msra.mxu0 %v32_v13 }
  0x22   :  { %62 = vmatpush.msra.mxu0 %v31_v14 }
  0x24   :  { %63 = vmatpush.msra.mxu0 %v30_v15 }
  0x25   :  { %64 = vmatmul.f32.vlgmr.msra.gmra.mxu0 %v47_v16 }
  0xa2   :  { %v65_v20 = vpop.f32.mrf.mxu0 }
  0xa3   :  { %v70_v21 = vadd.f32 %v69_v19, %v65_v20 }
  0xa5   :  { %71 = vst [vmem:[%s144_s3] sm:$0x1] %v70_v21 }
  0xa6   :  { %76 = vsyncpa [#allocation3], 1 }

</bundles_post_ra>
